<compile_context>
chip_gen: v6e
topology: v6e:2x2x1
jax: 0.10.0
libtpu: 0.0.40
codegen_flags: <defaults>
</compile_context>

<pallas_src>
import jax
import jax.numpy as jnp
from jax.experimental import pallas as pl
from jax.experimental.pallas import tpu as pltpu


# ------------------------------- kernel --------------------------------------

def lr_probe_kernel(x_ref, w_ref, b_ref, o_ref):
    # x_ref: (tile_n, D) native dtype    w_ref: (1, D) f32
    # b_ref: (1, 1) f32                  o_ref: (1, tile_n) f32  (lane-dense)
    xf = x_ref[...].astype(jnp.float32)                # VPU cast (slack)
    logits = jnp.sum(xf * w_ref[...], axis=-1)         # VPU mul + XLU reduce -> (tile_n,)
    logits = jnp.reshape(logits, (1, -1)) + b_ref[...] # lane-major row (1, tile_n)
    # Exact sigmoid: exp on the EUP, exact divide on the VPU.
    o_ref[...] = 1.0 / (1.0 + jnp.exp(-logits))


# ------------------------------- wrapper --------------------------------------

_MIB = 1024 * 1024
_X_TILE_BUDGET_BYTES = 4 * _MIB   # per x buffer (Pallas double-buffers it)
_MIN_TILE_ROWS = 128              # lane-dense output block wants 128-multiples
_MAX_TILE_ROWS = 8192             # bounds whole-tile intermediate vreg/VMEM pressure


def _vmem_limit_bytes():
    """Generation-aware scoped-VMEM limit (v5e/v6e: 128 MiB VMEM, v7x: 64 MiB/TC)."""
    cap = 64 * _MIB
    try:
        info = pltpu.get_tpu_info()
        cap = int(getattr(info, "vmem_capacity_bytes", cap) or cap)
    except Exception:
        pass
    return 64 * _MIB if cap >= 96 * _MIB else 40 * _MIB


def _pick_tile_n(n, d, itemsize):
    """Byte-targeted row tile: multiple of 128, >=2 grid steps when N allows."""
    row_bytes = max(1, d * itemsize)
    tile = _X_TILE_BUDGET_BYTES // row_bytes
    tile = max(_MIN_TILE_ROWS, min(_MAX_TILE_ROWS, (tile // 128) * 128))
    # Guarantee >= 2 grid steps for large N so the "parallel" axis can split
    # across v7x's two TensorCores (harmless single step for tiny N).
    two_step = 128 * pl.cdiv(pl.cdiv(n, 2), 128)
    tile = min(tile, max(_MIN_TILE_ROWS, two_step))
    return tile


def lr_probe_forward(x, weight, bias=None):
    """Pallas implementation of LRProbe.forward.

    x:      (..., D) activations (bf16 or f32; streamed in native dtype)
    weight: (D,) or (1, D)  nn.Linear(d_in, 1).weight
    bias:   optional scalar (nn.Linear bias); None => bias=False
    returns (...,) f32 sigmoid probabilities
    """
    x = jnp.asarray(x)
    lead_shape = x.shape[:-1]
    D = x.shape[-1]
    x2 = x.reshape(-1, D)
    N = x2.shape[0]
    itemsize = jnp.dtype(x2.dtype).itemsize

    # Probe weight kept in f32 regardless of activation dtype (fidelity).
    w_row = jnp.asarray(weight, jnp.float32).reshape(1, D)
    if bias is None:
        b = jnp.zeros((1, 1), jnp.float32)
    else:
        b = jnp.asarray(bias, jnp.float32).reshape(1, 1)

    tile_n = _pick_tile_n(N, D, itemsize)
    grid = (pl.cdiv(N, tile_n),)   # ragged last block handled by Pallas (no pad copy)

    out = pl.pallas_call(
        lr_probe_kernel,
        out_shape=jax.ShapeDtypeStruct((1, N), jnp.float32),
        grid=grid,
        in_specs=[
            pl.BlockSpec((tile_n, D), lambda i: (i, 0)),   # x rows (native dtype)
            pl.BlockSpec((1, D), lambda i: (0, 0)),        # weight row, f32, resident
            pl.BlockSpec((1, 1), lambda i: (0, 0)),        # bias scalar, f32
        ],
        out_specs=pl.BlockSpec((1, tile_n), lambda i: (0, i)),   # lane-dense
        compiler_params=pltpu.CompilerParams(
            dimension_semantics=("parallel",),
            vmem_limit_bytes=_vmem_limit_bytes(),
        ),
        cost_estimate=pl.CostEstimate(
            flops=2 * N * D,
            transcendentals=N,
            bytes_accessed=N * D * itemsize + D * 4 + 4 + N * 4,
        ),
    )(x2, w_row, b)

    return out[0].reshape(lead_shape)


def lr_probe_pred(x, weight, bias=None):
    # LRProbe.pred: round the sigmoid output.
    return jnp.round(lr_probe_forward(x, weight, bias=bias))


# TODO(synk): LRProbe.fit / from_data / accuracy (sklearn newton-cholesky,
# AdamW SGD, elk) are training procedures, not forward-pass ops; not kernels.


# ------------------------------- main -----------------------------------------

if __name__ == "__main__":
    N, D = 8, 32
    key = jax.random.PRNGKey(0)
    kx, kw, kb = jax.random.split(key, 3)

    x = jax.random.normal(kx, (N, D), dtype=jnp.float32)
    # nn.Linear(d_in, 1) weight is [1, d_in]; bias is [1].
    weight = jax.random.normal(kw, (1, D), dtype=jnp.float32) / jnp.sqrt(D)
    bias = jax.random.normal(kb, (1,), dtype=jnp.float32)

    def ref_fwd(xx, ww, bb=None):
        z = jnp.dot(xx.astype(jnp.float32), ww.astype(jnp.float32),
                    precision=jax.lax.Precision.HIGHEST)
        if bb is not None:
            z = z + bb
        return jax.nn.sigmoid(z)

    # bias=False (module default)
    out = jax.block_until_ready(lr_probe_forward(x, weight[0]))
    ref = ref_fwd(x, weight[0])
    assert out.shape == (N,)
    assert jnp.allclose(out, ref, atol=1e-3), "bias=False mismatch"

    # bias=True path
    out_b = jax.block_until_ready(lr_probe_forward(x, weight[0], bias=bias[0]))
    ref_b = ref_fwd(x, weight[0], bias[0])
    assert jnp.allclose(out_b, ref_b, atol=1e-3), "bias=True mismatch"

    # bf16 activations streamed natively; weight stays f32, accumulation f32.
    x_bf16 = x.astype(jnp.bfloat16)
    out_bf = jax.block_until_ready(lr_probe_forward(x_bf16, weight[0]))
    ref_bf = ref_fwd(x_bf16, weight[0])
    assert jnp.allclose(out_bf, ref_bf, atol=2e-2), "bf16 mismatch"

    # Ragged batch: exercises the masked last block (no wrapper-side padding copy).
    x_rag = jax.random.normal(kx, (10, D), dtype=jnp.float32)
    out_rag = jax.block_until_ready(lr_probe_forward(x_rag, weight[0]))
    ref_rag = ref_fwd(x_rag, weight[0])
    assert out_rag.shape == (10,)
    assert jnp.allclose(out_rag, ref_rag, atol=1e-3), "ragged-N mismatch"

    # pred path: round(forward)
    preds = jax.block_until_ready(lr_probe_pred(x, weight[0]))
    assert jnp.allclose(preds, jnp.round(out)), "pred mismatch"

    print("KERNEL_OK")
</pallas_src>

<mosaic_0001>
module attributes {stable_mosaic.version = 11 : i64} {
  func.func @lr_probe_kernel(%arg0: i32, %arg1: memref<128x32xf32, #tpu.memory_space<vmem>>, %arg2: memref<1x32xf32, #tpu.memory_space<vmem>>, %arg3: memref<1x1xf32, #tpu.memory_space<vmem>>, %arg4: memref<1x128xf32, #tpu.memory_space<vmem>>) attributes {dimension_semantics = [#tpu.dimension_semantics<parallel>], iteration_bounds = array<i64: 1>, scalar_prefetch = 0 : i64, scratch_operands = 0 : i64, tpu.core_type = #tpu.core_type<tc>, window_params = [{transform_indices = @transform_0, window_bounds = array<i64: 128, 32>}, {pipeline_mode = #tpu.pipeline_mode<synchronous>, transform_indices = @transform_1, window_bounds = array<i64: 1, 32>}, {pipeline_mode = #tpu.pipeline_mode<synchronous>, transform_indices = @transform_2, window_bounds = array<i64: 1, 1>}, {transform_indices = @transform_3, window_bounds = array<i64: 1, 128>}]} {
    %c0 = arith.constant 0 : index
    %c0_0 = arith.constant 0 : index
    %0 = vector.load %arg1[%c0, %c0_0] : memref<128x32xf32, #tpu.memory_space<vmem>>, vector<128x32xf32>
    %c0_1 = arith.constant 0 : index
    %c0_2 = arith.constant 0 : index
    %1 = vector.load %arg2[%c0_1, %c0_2] : memref<1x32xf32, #tpu.memory_space<vmem>>, vector<1x32xf32>
    %2 = vector.broadcast %1 : vector<1x32xf32> to vector<128x32xf32>
    %3 = arith.mulf %0, %2 : vector<128x32xf32>
    %cst = arith.constant dense<0.000000e+00> : vector<128xf32>
    %4 = vector.multi_reduction <add>, %3, %cst [1] : vector<128x32xf32> to vector<128xf32>
    %5 = vector.shape_cast %4 : vector<128xf32> to vector<1x128xf32>
    %c0_3 = arith.constant 0 : index
    %c0_4 = arith.constant 0 : index
    %6 = vector.load %arg3[%c0_3, %c0_4] : memref<1x1xf32, #tpu.memory_space<vmem>>, vector<1x1xf32>
    %7 = vector.broadcast %6 : vector<1x1xf32> to vector<1x128xf32>
    %8 = arith.addf %5, %7 : vector<1x128xf32>
    %cst_5 = arith.constant 0.000000e+00 : f32
    %9 = vector.broadcast %cst_5 : f32 to vector<1x128xf32>
    %10 = arith.subf %9, %8 : vector<1x128xf32>
    %11 = math.exp %10 : vector<1x128xf32>
    %cst_6 = arith.constant 1.000000e+00 : f32
    %12 = vector.broadcast %cst_6 : f32 to vector<1x128xf32>
    %13 = arith.addf %12, %11 : vector<1x128xf32>
    %cst_7 = arith.constant 1.000000e+00 : f32
    %14 = vector.broadcast %cst_7 : f32 to vector<1x128xf32>
    %15 = arith.divf %14, %13 : vector<1x128xf32>
    %c0_8 = arith.constant 0 : index
    %c0_9 = arith.constant 0 : index
    %16 = vector.load %arg4[%c0_8, %c0_9] : memref<1x128xf32, #tpu.memory_space<vmem>>, vector<1x128xf32>
    tpu.vector_store %arg4[%c0_8, %c0_9], %15 {strides = array<i32>} : memref<1x128xf32, #tpu.memory_space<vmem>>, vector<1x128xf32>,
    return
  }
  func.func @transform_0(%arg0: i32) -> (i32, i32) {
    %c0_i32 = arith.constant 0 : i32
    %c0_i32_0 = arith.constant 0 : i32
    return %arg0, %c0_i32 : i32, i32
  }
  func.func @transform_1(%arg0: i32) -> (i32, i32) {
    %c0_i32 = arith.constant 0 : i32
    %c0_i32_0 = arith.constant 0 : i32
    %c0_i32_1 = arith.constant 0 : i32
    return %c0_i32, %c0_i32_0 : i32, i32
  }
  func.func @transform_2(%arg0: i32) -> (i32, i32) {
    %c0_i32 = arith.constant 0 : i32
    %c0_i32_0 = arith.constant 0 : i32
    %c0_i32_1 = arith.constant 0 : i32
    return %c0_i32, %c0_i32_0 : i32, i32
  }
  func.func @transform_3(%arg0: i32) -> (i32, i32) {
    %c0_i32 = arith.constant 0 : i32
    %c0_i32_0 = arith.constant 0 : i32
    return %c0_i32, %arg0 : i32, i32
  }
}

</mosaic_0001>

<bundles_post_ra>
// kernel: tpu_custom_call.1
= control target key start
LH: loop header
LB: loop body
LE: loop exit
PB: predicated region body
PF: predicated region fallthrough
CT: control target
= control target key end

     0   :  { %s629_s0 = inlined_call_operand.hbm [shape: f32[8,32], index: 0, kind: input, shape index: {}]   ;;  %s630_s1 = inlined_call_operand.vmem [shape: f32[1,32], index: 1, kind: input, shape index: {}]   ;;  %s631_s2 = inlined_call_operand.<no memory space> [shape: f32[1,1], index: 2, kind: input, shape index: {}]   ;;  %s632_s3 = inlined_call_operand.hbm [shape: f32[1,8], index: 3, kind: output, shape index: {}]  }
   0x1   :  { %v8_v0 = vstv %s631_s2 }
   0x2   :  { %9 = vst [vmem:[#allocation2] sm:$0x1] %v8_v0 }
   0x3   :  { %10 = vsyncpa [#allocation4], 0 }
   0x4   :  { %11 = vsyncpa [#allocation5], 0 }
   0x5   :  { %16 = vsyncadd [#allocation4], 1920  ;;  %s501_s14 = smov [#allocation3]  }
   0x6   :  { %s17_s15 = sshll.u32 %s501_s14, 4  ;;  %s18_s15 = int_to_ptr.vmem [resolvable:$true] %s17_s15 }
   0x7   :  { %s465_s16 = scalar_lea.vmem %s18_s15, 128  ;;  %s469_s17 = scalar_lea.vmem %s18_s15, 2048 }
   0x8   :  { %p466_p0 = scmp.ne.s32.totalorder %s18_s15, %s465_s16  ;;  %p470_p1 = scmp.lt.s32.totalorder %s18_s15, %s18_s15 }
   0x9   :  { %p471_p2 = scmp.lt.s32.totalorder %s469_s17, %s465_s16 }
   0xb   :  { %p472_p3 = por %p471_p2, %p470_p1 }
   0xd   :  { %p473_p4 = pnand %p472_p3, %p466_p0 }
   0xf   :  { %476 = shalt.err (!%p473_p4)
}
  0x10   :  { %s502_s18 = smov 128   ;;  %s503_s19 = smov 8  }
  0x11   :  { %23 = dma.hbm_to_vmem [thread:$0]  %s629_s0, 128, %s18_s15, [#allocation4], %s502_s18, %s502_s18, %s503_s19  }
  0x12   :  { %497 = dma.done.wait [#allocation4], 2048  }
  0x13   :  { %498 = vsyncadd [#allocation4], 4294965248  ;;  %v504_v1 = vmov 0   ;;  %v33_v2 = vld [vmem:[#allocation3 + $0x10] sm:$0xff]  ;;  %v535_v3 = vld [vmem:[%s630_s1] ss:$0 sm:$0xff]  ;;  %v125_v57 = vlaneseq }
  0x14   :  { %391 = vset.pattern.permute.xlu1 %v504_v1  ;;  %392 = vset.pattern.permute.xlu0 %v504_v1  ;;  %vm70_vm0 = vcmask 261120   ;;  %v31_v4 = vld [vmem:[#allocation3] sm:$0xff]  ;;  %v56_v5 = vmul.f32 %v535_v3, %v33_v2  ;;  %v34_v7 = vld [vmem:[#allocation3 + $0x18] sm:$0xff]  ;;  %v32_v8 = vld [vmem:[#allocation3 + $0x8] sm:$0xff]  ;;  %vm268_vm1 = vcmask 130112   ;;  %vm275_vm2 = vcmask 195712  }
  0x15   :  { %v54_v6 = vmul.f32 %v535_v3, %v31_v4  ;;  %v57_v9 = vmul.f32 %v535_v3, %v34_v7  ;;  %v55_v10 = vmul.f32 %v535_v3, %v32_v8  ;;  %v36_v11 = vld [vmem:[#allocation3 + $0x28] sm:$0xff]  ;;  %v35_v12 = vld [vmem:[#allocation3 + $0x20] sm:$0xff]  ;;  %v37_v19 = vld [vmem:[#allocation3 + $0x30] sm:$0xff]  ;;  %v570_v59 = vshrl.u32 %v125_v57, 7  ;;  %s505_s0 = smov [#allocation6]  }
  0x16   :  { %v77_v13 = vsel %vm70_vm0, %v56_v5, 0.0  ;;  %v59_v17 = vmul.f32 %v535_v3, %v36_v11  ;;  %v58_v18 = vmul.f32 %v535_v3, %v35_v12  ;;  %v60_v22 = vmul.f32 %v535_v3, %v37_v19  ;;  %v38_v23 = vld [vmem:[#allocation3 + $0x38] sm:$0xff]  ;;  %v39_v26 = vld [vmem:[#allocation3 + $0x40] sm:$0xff]  ;;  %v40_v29 = vld [vmem:[#allocation3 + $0x48] sm:$0xff]  ;;  %s376_s1 = sshll.u32 %s505_s0, 4  ;;  %s377_s1 = int_to_ptr.vmem [resolvable:$true] %s376_s1 }
  0x17   :  { %v71_v14 = vsel %vm70_vm0, %v54_v6, 0.0  ;;  %78 = vadd.xlane.f32.xlu1 %v77_v13  ;;  %v80_v15 = vsel %vm70_vm0, %v57_v9, 0.0  ;;  %v74_v16 = vsel %vm70_vm0, %v55_v10, 0.0  ;;  %v61_v25 = vmul.f32 %v535_v3, %v38_v23  ;;  %v41_v32 = vld [vmem:[#allocation3 + $0x50] sm:$0xff]  ;;  %v119_v35 = vld [vmem:[#allocation2] sm:$0x1]  ;;  %p482_p6 = scmp.lt.s32.totalorder %s377_s1, %s377_s1 }
  0x18   :  { %72 = vadd.xlane.f32.xlu0 %v71_v14  ;;  %v86_v20 = vsel %vm70_vm0, %v59_v17, 0.0  ;;  %v83_v21 = vsel %vm70_vm0, %v58_v18, 0.0  ;;  %v89_v24 = vsel %vm70_vm0, %v60_v22, 0.0  ;;  %v62_v28 = vmul.f32 %v535_v3, %v39_v26  ;;  %v43_v36 = vld [vmem:[#allocation3 + $0x60] sm:$0xff]  ;;  %v44_v39 = vld [vmem:[#allocation3 + $0x68] sm:$0xff]  ;;  %v45_v42 = vld [vmem:[#allocation3 + $0x70] sm:$0xff] }
  0x19   :  { %v92_v27 = vsel %vm70_vm0, %v61_v25, 0.0  ;;  %v63_v31 = vmul.f32 %v535_v3, %v40_v29  ;;  %v64_v34 = vmul.f32 %v535_v3, %v41_v32  ;;  %v66_v38 = vmul.f32 %v535_v3, %v43_v36  ;;  %v46_v45 = vld [vmem:[#allocation3 + $0x78] sm:$0xff]  ;;  %s477_s23 = scalar_lea.vmem %s377_s1, 16  ;;  %s481_s24 = scalar_lea.vmem %s377_s1, 32 }
  0x1a   :  { %v95_v30 = vsel %vm70_vm0, %v62_v28, 0.0  ;;  %v67_v41 = vmul.f32 %v535_v3, %v44_v39  ;;  %v68_v44 = vmul.f32 %v535_v3, %v45_v42  ;;  %v69_v47 = vmul.f32 %v535_v3, %v46_v45  ;;  %v42_v49 = vld [vmem:[#allocation3 + $0x58] sm:$0xff]  ;;  %p478_p5 = scmp.ne.s32.totalorder %s377_s1, %s477_s23  ;;  %p483_p7 = scmp.lt.s32.totalorder %s481_s24, %s477_s23 }
  0x1b   :  { %81 = vadd.xlane.f32.xlu1 %v80_v15  ;;  %v98_v33 = vsel %vm70_vm0, %v63_v31, 0.0  ;;  %v101_v37 = vsel %vm70_vm0, %v64_v34, 0.0  ;;  %v107_v40 = vsel %vm70_vm0, %v66_v38, 0.0  ;;  %v65_v50 = vmul.f32 %v535_v3, %v42_v49 }
  0x1c   :  { %75 = vadd.xlane.f32.xlu0 %v74_v16  ;;  %v110_v43 = vsel %vm70_vm0, %v67_v41, 0.0  ;;  %v113_v46 = vsel %vm70_vm0, %v68_v44, 0.0  ;;  %v116_v48 = vsel %vm70_vm0, %v69_v47, 0.0  ;;  %v127_v61 = vsub.s32 0, %v570_v59  ;;  %p484_p8 = por %p483_p7, %p482_p6 }
  0x1d   :  { %v104_v51 = vsel %vm70_vm0, %v65_v50, 0.0  ;;  %vm282_vm3 = vcmask 261312   ;;  %vm289_vm4 = vcmask 326912   ;;  %vm296_vm5 = vcmask 392512  }
  0x1e   :  { %vm303_vm6 = vcmask 458112   ;;  %vm310_vm7 = vcmask 523712   ;;  %vm317_vm8 = vcmask 589312   ;;  %vm324_vm9 = vcmask 654912   ;;  %p485_p9 = pnand %p484_p8, %p478_p5 }
  0x1f   :  { %87 = vadd.xlane.f32.xlu1 %v86_v20  ;;  %vm331_vm10 = vcmask 720512   ;;  %vm338_vm11 = vcmask 786112   ;;  %vm345_vm12 = vcmask 851712   ;;  %vm352_vm13 = vcmask 917312  }
  0x20   :  { %84 = vadd.xlane.f32.xlu0 %v83_v21  ;;  %vm359_vm14 = vcmask 982912   ;;  %vm366_vm15 = vcmask 1048512  }
  0x24   :  { %90 = vadd.xlane.f32.xlu0 %v89_v24 }
  0x28   :  { %93 = vadd.xlane.f32.xlu0 %v92_v27 }
  0x2c   :  { %96 = vadd.xlane.f32.xlu0 %v95_v30 }
  0x30   :  { %99 = vadd.xlane.f32.xlu0 %v98_v33  ;;  %122 = vperm.xlu1 %391, %v119_v35  }
  0x34   :  { %102 = vadd.xlane.f32.xlu0 %v101_v37 }
  0x38   :  { %108 = vadd.xlane.f32.xlu0 %v107_v40 }
  0x3c   :  { %111 = vadd.xlane.f32.xlu0 %v110_v43 }
  0x40   :  { %114 = vadd.xlane.f32.xlu0 %v113_v46 }
  0x44   :  { %117 = vadd.xlane.f32.xlu0 %v116_v48 }
  0x54   :  { %105 = vadd.xlane.f32.xlu1 %v104_v51 }
  0xa0   :  { %v79_v52 = vpop.xlane.xlu1 %78 }
  0xa1   :  { %v73_v53 = vpop.xlane.xlu0 %72 }
  0xa4   :  { %v82_v55 = vpop.xlane.xlu1 %81 }
  0xa5   :  { %v76_v54 = vpop.xlane.xlu0 %75 }
  0xa8   :  { %v88_v58 = vpop.xlane.xlu1 %87 }
  0xa9   :  { %v85_v56 = vpop.xlane.xlu0 %84 }
  0xac   :  { %v123_v63 = vpop.permute.xlu1 %122 }
  0xad   :  { %v91_v60 = vpop.xlane.xlu0 %90  ;;  %v573_v0 = vrot.slane %v123_v63, %v127_v61  ;;  %v591_v61 = vand.u32 127, %v125_v57 }
  0xaf   :  { %v129_v3 = vadd.f32 %v573_v0, %v73_v53  ;;  %v130_v4 = vadd.f32 %v573_v0, %v76_v54  ;;  %v131_v6 = vadd.f32 %v573_v0, %v79_v52  ;;  %v132_v11 = vadd.f32 %v573_v0, %v82_v55 }
  0xb0   :  { %v133_v14 = vadd.f32 %v573_v0, %v85_v56  ;;  %v134_v17 = vadd.f32 %v573_v0, %v88_v58  ;;  %v135_v20 = vadd.f32 %v573_v0, %v91_v60 }
  0xb1   :  { %v94_v62 = vpop.xlane.xlu0 %93  ;;  %v145_v7 = vsub.f32 0.0, %v129_v3  ;;  %v146_v8 = vsub.f32 0.0, %v130_v4  ;;  %v147_v9 = vsub.f32 0.0, %v131_v6  ;;  %v148_v16 = vsub.f32 0.0, %v132_v11 }
  0xb2   :  { %v149_v19 = vsub.f32 0.0, %v133_v14  ;;  %v136_v22 = vadd.f32 %v573_v0, %v94_v62  ;;  %v150_v24 = vsub.f32 0.0, %v134_v17  ;;  %v151_v26 = vsub.f32 0.0, %v135_v20 }
  0xb3   :  { %v161_v10 = vmul.f32 1.442695, %v145_v7  ;;  %v163_v12 = vmul.f32 1.442695, %v146_v8  ;;  %v165_v15 = vmul.f32 1.442695, %v147_v9 }
  0xb4   :  { %v167_v21 = vmul.f32 1.442695, %v148_v16  ;;  %v169_v25 = vmul.f32 1.442695, %v149_v19  ;;  %v152_v27 = vsub.f32 0.0, %v136_v22  ;;  %v263_v7 = vadd.s32 4294967288, %v591_v61 }
  0xb5   :  { %v97_v1 = vpop.xlane.xlu0 %96  ;;  %393 = vpow2.f32 %v161_v10  ;;  %v171_v32 = vmul.f32 1.442695, %v150_v24  ;;  %v173_v34 = vmul.f32 1.442695, %v151_v26  ;;  %v277_v24 = vadd.s32 4294967272, %v591_v61 }
  0xb6   :  { %395 = vpow2.f32 %v163_v12  ;;  %v137_v23 = vadd.f32 %v573_v0, %v97_v1  ;;  %v175_v36 = vmul.f32 1.442695, %v152_v27  ;;  %v270_v12 = vadd.s32 4294967280, %v591_v61 }
  0xb7   :  { %397 = vpow2.f32 %v165_v15  ;;  %v266_v14 = vsub.s32 %v263_v7, %v570_v59  ;;  %v284_v27 = vadd.s32 4294967264, %v591_v61 }
  0xb8   :  { %399 = vpow2.f32 %v167_v21  ;;  %v153_v30 = vsub.f32 0.0, %v137_v23  ;;  %v273_v19 = vsub.s32 %v270_v12, %v570_v59 }
  0xb9   :  { %v100_v2 = vpop.xlane.xlu0 %99  ;;  %401 = vpow2.f32 %v169_v25 }
  0xba   :  { %v138_v28 = vadd.f32 %v573_v0, %v100_v2  ;;  %v177_v38 = vmul.f32 1.442695, %v153_v30  ;;  %403 = vpow2.f32 %v171_v32 }
  0xbb   :  { %405 = vpow2.f32 %v173_v34 }
  0xbc   :  { %v154_v37 = vsub.f32 0.0, %v138_v28  ;;  %407 = vpow2.f32 %v175_v36 }
  0xbd   :  { %v103_v5 = vpop.xlane.xlu0 %102  ;;  %409 = vpow2.f32 %v177_v38  ;;  %v287_v38 = vsub.s32 %v284_v27, %v570_v59 }
  0xbe   :  { %v139_v31 = vadd.f32 %v573_v0, %v103_v5  ;;  %v179_v46 = vmul.f32 1.442695, %v154_v37 }
  0xc0   :  { %v155_v39 = vsub.f32 0.0, %v139_v31 }
  0xc1   :  { %v109_v13 = vpop.xlane.xlu0 %108 }
  0xc2   :  { %v394_v33 = vpop.eup %393  ;;  %v141_v40 = vadd.f32 %v573_v0, %v109_v13  ;;  %v181_v48 = vmul.f32 1.442695, %v155_v39  ;;  %v261_v13 = vsub.s32 %v591_v61, %v570_v59 }
  0xc3   :  { %v396_v35 = vpop.eup %395  ;;  %v193_v43 = vadd.f32 1.0, %v394_v33  ;;  %v280_v33 = vsub.s32 %v277_v24, %v570_v59 }
  0xc4   :  { %v398_v44 = vpop.eup %397  ;;  %v194_v45 = vadd.f32 1.0, %v396_v35  ;;  %v157_v49 = vsub.f32 0.0, %v141_v40  ;;  %v291_v35 = vadd.s32 4294967256, %v591_v61 }
  0xc5   :  { %v112_v18 = vpop.xlane.xlu0 %111  ;;  %v195_v52 = vadd.f32 1.0, %v398_v44  ;;  %411 = vrcp.f32 %v193_v43  ;;  %v400_v53 = vpop.eup %399  ;;  %v298_v43 = vadd.s32 4294967248, %v591_v61 }
  0xc6   :  { %v142_v41 = vadd.f32 %v573_v0, %v112_v18  ;;  %413 = vrcp.f32 %v194_v45  ;;  %v185_v55 = vmul.f32 1.442695, %v157_v49  ;;  %v402_v60 = vpop.eup %401  ;;  %v196_v63 = vadd.f32 1.0, %v400_v53 }
  0xc7   :  { %415 = vpow2.f32 %v179_v46  ;;  %v404_v4 = vpop.eup %403  ;;  %v197_v6 = vadd.f32 1.0, %v402_v60  ;;  %v301_v53 = vsub.s32 %v298_v43, %v570_v59  ;;  %v319_v60 = vadd.s32 4294967224, %v591_v61 }
  0xc8   :  { %v158_v51 = vsub.f32 0.0, %v142_v41  ;;  %417 = vpow2.f32 %v181_v48  ;;  %v406_v8 = vpop.eup %405  ;;  %v198_v57 = vadd.f32 1.0, %v404_v4 }
  0xc9   :  { %v115_v29 = vpop.xlane.xlu0 %114  ;;  %419 = vrcp.f32 %v195_v52  ;;  %v408_v10 = vpop.eup %407  ;;  %v199_v16 = vadd.f32 1.0, %v406_v8  ;;  %v322_v7 = vsub.s32 %v319_v60, %v570_v59  ;;  %v333_v8 = vadd.s32 4294967208, %v591_v61 }
  0xca   :  { %v143_v47 = vadd.f32 %v573_v0, %v115_v29  ;;  %v187_v58 = vmul.f32 1.442695, %v158_v51  ;;  %421 = vpow2.f32 %v185_v55  ;;  %v410_v11 = vpop.eup %409  ;;  %v200_v21 = vadd.f32 1.0, %v408_v10 }
  0xcb   :  { %v201_v25 = vadd.f32 1.0, %v410_v11  ;;  %v312_v55 = vadd.s32 4294967232, %v591_v61  ;;  %v340_v11 = vadd.s32 4294967200, %v591_v61 }
  0xcc   :  { %v159_v54 = vsub.f32 0.0, %v143_v47  ;;  %423 = vpow2.f32 %v187_v58  ;;  %v294_v47 = vsub.s32 %v291_v35, %v570_v59 }
  0xcd   :  { %v118_v42 = vpop.xlane.xlu0 %117  ;;  %425 = vrcp.f32 %v196_v63  ;;  %v326_v63 = vadd.s32 4294967216, %v591_v61 }
  0xce   :  { %v144_v50 = vadd.f32 %v573_v0, %v118_v42  ;;  %v189_v1 = vmul.f32 1.442695, %v159_v54  ;;  %v305_v54 = vadd.s32 4294967240, %v591_v61 }
  0xd0   :  { %v160_v56 = vsub.f32 0.0, %v144_v50  ;;  %427 = vpow2.f32 %v189_v1  ;;  %v308_v1 = vsub.s32 %v305_v54, %v570_v59 }
  0xd2   :  { %v191_v3 = vmul.f32 1.442695, %v160_v56 }
  0xd4   :  { %429 = vpow2.f32 %v191_v3 }
  0xd5   :  { %431 = vrcp.f32 %v197_v6 }
  0xdd   :  { %v106_v62 = vpop.xlane.xlu1 %105 }
  0xde   :  { %v140_v2 = vadd.f32 %v573_v0, %v106_v62  ;;  %v412_v0 = vpop.eup %411 }
  0xdf   :  { %v414_v15 = vpop.eup %413  ;;  %v262_v22 = vrot.slane %v412_v0, %v261_v13  ;;  %v347_v13 = vadd.s32 4294967192, %v591_v61 }
  0xe0   :  { %v156_v5 = vsub.f32 0.0, %v140_v2  ;;  %v416_v17 = vpop.eup %415  ;;  %v267_v23 = vrot.slane %v414_v15, %v266_v14  ;;  %v354_v15 = vadd.s32 4294967184, %v591_v61 }
  0xe1   :  { %v418_v18 = vpop.eup %417  ;;  %v202_v26 = vadd.f32 1.0, %v416_v17  ;;  %v350_v24 = vsub.s32 %v347_v13, %v570_v59 }
  0xe2   :  { %v183_v9 = vmul.f32 1.442695, %v156_v5  ;;  %v420_v20 = vpop.eup %419  ;;  %v203_v29 = vadd.f32 1.0, %v418_v18  ;;  %v269_v32 = vsel %vm268_vm1, %v267_v23, %v262_v22  ;;  %v315_v5 = vsub.s32 %v312_v55, %v570_v59 }
  0xe3   :  { %v422_v28 = vpop.eup %421  ;;  %v274_v30 = vrot.slane %v420_v20, %v273_v19  ;;  %v336_v18 = vsub.s32 %v333_v8, %v570_v59  ;;  %v361_v19 = vadd.s32 4294967176, %v591_v61  ;;  %v343_v22 = vsub.s32 %v340_v11, %v570_v59 }
  0xe4   :  { %433 = vpow2.f32 %v183_v9  ;;  %v424_v31 = vpop.eup %423  ;;  %v205_v37 = vadd.f32 1.0, %v422_v28  ;;  %v357_v27 = vsub.s32 %v354_v15, %v570_v59 }
  0xe5   :  { %435 = vrcp.f32 %v198_v57  ;;  %v426_v34 = vpop.eup %425  ;;  %v206_v40 = vadd.f32 1.0, %v424_v31  ;;  %v276_v41 = vsel %vm275_vm2, %v274_v30, %v269_v32  ;;  %v329_v57 = vsub.s32 %v326_v63, %v570_v59 }
  0xe6   :  { %437 = vrcp.f32 %v199_v16  ;;  %v428_v36 = vpop.eup %427  ;;  %v281_v44 = vrot.slane %v426_v34, %v280_v33  ;;  %v364_v61 = vsub.s32 %v361_v19, %v570_v59 }
  0xe7   :  { %439 = vrcp.f32 %v200_v21  ;;  %v430_v39 = vpop.eup %429  ;;  %v207_v46 = vadd.f32 1.0, %v428_v36 }
  0xe8   :  { %441 = vrcp.f32 %v201_v25  ;;  %v432_v42 = vpop.eup %431  ;;  %v208_v48 = vadd.f32 1.0, %v430_v39  ;;  %v283_v50 = vsel %vm282_vm3, %v281_v44, %v276_v41 }
  0xe9   :  { %443 = vrcp.f32 %v202_v26  ;;  %v288_v52 = vrot.slane %v432_v42, %v287_v38 }
  0xea   :  { %445 = vrcp.f32 %v203_v29 }
  0xeb   :  { %447 = vrcp.f32 %v205_v37  ;;  %v290_v56 = vsel %vm289_vm4, %v288_v52, %v283_v50 }
  0xec   :  { %449 = vrcp.f32 %v206_v40 }
  0xf1   :  { %v434_v45 = vpop.eup %433 }
  0xf2   :  { %v204_v49 = vadd.f32 1.0, %v434_v45  ;;  %v436_v51 = vpop.eup %435 }
  0xf3   :  { %v438_v58 = vpop.eup %437  ;;  %v295_v62 = vrot.slane %v436_v51, %v294_v47 }
  0xf4   :  { %451 = vrcp.f32 %v204_v49  ;;  %v440_v3 = vpop.eup %439  ;;  %v302_v4 = vrot.slane %v438_v58, %v301_v53 }
  0xf5   :  { %453 = vrcp.f32 %v207_v46  ;;  %v297_v2 = vsel %vm296_vm5, %v295_v62, %v290_v56  ;;  %v442_v6 = vpop.eup %441  ;;  %v309_v0 = vrot.slane %v440_v3, %v308_v1 }
  0xf6   :  { %455 = vrcp.f32 %v208_v48  ;;  %v444_v9 = vpop.eup %443  ;;  %v304_v10 = vsel %vm303_vm6, %v302_v4, %v297_v2  ;;  %v316_v14 = vrot.slane %v442_v6, %v315_v5 }
  0xf7   :  { %v446_v12 = vpop.eup %445  ;;  %v323_v16 = vrot.slane %v444_v9, %v322_v7  ;;  %v311_v17 = vsel %vm310_vm7, %v309_v0, %v304_v10 }
  0xf8   :  { %v448_v20 = vpop.eup %447  ;;  %v330_v21 = vrot.slane %v446_v12, %v329_v57  ;;  %v318_v26 = vsel %vm317_vm8, %v316_v14, %v311_v17 }
  0xf9   :  { %v450_v23 = vpop.eup %449  ;;  %v325_v29 = vsel %vm324_vm9, %v323_v16, %v318_v26  ;;  %v344_v33 = vrot.slane %v448_v20, %v343_v22 }
  0xfa   :  { %v332_v32 = vsel %vm331_vm10, %v330_v21, %v325_v29  ;;  %v351_v35 = vrot.slane %v450_v23, %v350_v24 }
 0x101   :  { %v452_v25 = vpop.eup %451 }
 0x102   :  { %v454_v28 = vpop.eup %453  ;;  %v337_v30 = vrot.slane %v452_v25, %v336_v18 }
 0x103   :  { %v456_v31 = vpop.eup %455  ;;  %v358_v37 = vrot.slane %v454_v28, %v357_v27 }
 0x104   :  { %v339_v34 = vsel %vm338_vm11, %v337_v30, %v332_v32  ;;  %v365_v39 = vrot.slane %v456_v31, %v364_v61 }
 0x105   :  { %v346_v36 = vsel %vm345_vm12, %v344_v33, %v339_v34 }
 0x106   :  { %v353_v38 = vsel %vm352_vm13, %v351_v35, %v346_v36 }
 0x107   :  { %v360_v40 = vsel %vm359_vm14, %v358_v37, %v353_v38 }
 0x108   :  { %v367_v41 = vsel %vm366_vm15, %v365_v39, %v360_v40 }
 0x109   :  { %369 = vst [vmem:[#allocation6] sm:$0x1] %v367_v41 }
 0x10a   :  { %488 = shalt.err (!%p485_p9)
}
 0x10b   :  { %379 = dma.vmem_to_hbm [thread:$0]  %s377_s1, 16, %s632_s3, [#allocation5]  }
 0x10c   :  { %499 = dma.done.wait [#allocation5], 16  }
 0x10d   :  { %500 = vsyncadd [#allocation5], 4294967280 }
 0x10e   :  { %383 = vsyncpa [#allocation4], 1 }
 0x10f   :  { %384 = vsyncpa [#allocation5], 1 }

</bundles_post_ra>
